<compile_context>
chip_gen: v6e
topology: v6e:2x2x1
jax: 0.10.0
libtpu: 0.0.40
codegen_flags: <defaults>
</compile_context>

<pallas_src>
import jax
import jax.numpy as jnp
from jax.experimental import pallas as pl
from jax.experimental.pallas import tpu as pltpu

_LANE = 128
_FAST_PATH_MAX_ELEMS = 128 * 1024     # below this, fused XLA wins on latency
_TARGET_TILE_BYTES = 3 << 20          # ~3 MiB tiles amortize per-step overhead


def _silu_kernel(x_ref, o_ref):
    # silu(x) = x * sigmoid(x) = 0.5 * x * (1 + tanh(0.5*x))
    # -> exactly one EUP transcendental per element; kept in f32 for accuracy
    #    and v5e compatibility (no bf16 EUP there). Hidden under DMA anyway.
    xf = x_ref[...].astype(jnp.float32)
    o_ref[...] = (0.5 * xf * (1.0 + jnp.tanh(0.5 * xf))).astype(o_ref.dtype)


def _sublane(dtype):
    itemsize = jnp.dtype(dtype).itemsize
    return 8 * (4 // itemsize) if itemsize in (1, 2, 4) else 8


def _vmem_cap_bytes():
    # Generation-aware scoped-VMEM ceiling: ~half of physical per-core VMEM
    # (v7x: 64 MiB -> 32 MiB; v5e/v6e: 128 MiB -> capped at 48 MiB).
    try:
        cap = pltpu.get_tpu_info().vmem_capacity_bytes // 2
    except Exception:  # pragma: no cover - conservative fallback
        cap = 32 << 20
    return max(16 << 20, min(cap, 48 << 20))


def _silu_pallas_2d(x2d):
    """Run the streaming SiLU kernel on a (rows, width) array, width % 128 == 0."""
    rows, width = x2d.shape
    dtype = x2d.dtype
    itemsize = jnp.dtype(dtype).itemsize
    sub = _sublane(dtype)

    # Byte-targeted block rows (~_TARGET_TILE_BYTES per tile), multiple of the
    # dtype's native sublane tile, never (much) larger than the array itself.
    br = max(sub, (_TARGET_TILE_BYTES // (width * itemsize)) // sub * sub)
    br = min(br, pl.cdiv(rows, sub) * sub)

    # Keep >=2 roughly balanced grid steps so the "parallel" axis can shard
    # across both TensorCores on v7x (this kernel is purely HBM-bound).
    if pl.cdiv(rows, br) < 2 and rows > sub:
        br = max(sub, pl.cdiv(pl.cdiv(rows, 2), sub) * sub)
    grid = (pl.cdiv(rows, br),)

    tile_bytes = br * width * itemsize
    # Double-buffered input + output tiles plus headroom, under the cap.
    vmem_limit = min(max(4 * tile_bytes + (4 << 20), 16 << 20), _vmem_cap_bytes())

    return pl.pallas_call(
        _silu_kernel,
        out_shape=jax.ShapeDtypeStruct((rows, width), dtype),
        grid_spec=pltpu.PrefetchScalarGridSpec(
            num_scalar_prefetch=0,
            grid=grid,
            in_specs=[pl.BlockSpec((br, width), lambda i: (i, 0))],
            out_specs=pl.BlockSpec((br, width), lambda i: (i, 0)),
        ),
        compiler_params=pltpu.CompilerParams(
            dimension_semantics=("parallel",),
            vmem_limit_bytes=vmem_limit,
        ),
    )(x2d)


def silu(x):
    """Elementwise SiLU via Pallas. Accepts any shape / float dtype."""
    orig_shape = x.shape
    total = x.size

    if total == 0:
        return x
    if total < _FAST_PATH_MAX_ELEMS:
        # Small activations: pallas_call launch overhead dominates; fused XLA
        # elementwise is as fast or faster here.
        return x * jax.nn.sigmoid(x)

    x_flat = x.reshape(-1)

    # Prefer a wide, lane-dense layout (free reshape on contiguous data).
    width = None
    for w in (512, 256, 128):
        if total % w == 0:
            width = w
            break

    if width is not None:
        y2d = _silu_pallas_2d(x_flat.reshape(total // width, width))
        return y2d.reshape(orig_shape)

    # Misaligned total: run the kernel zero-copy on the 128-aligned prefix and
    # handle the tiny (<128 elem) tail with XLA; one concatenate instead of a
    # full pad + full output slice.
    aligned = (total // _LANE) * _LANE
    head = x_flat[:aligned].reshape(aligned // _LANE, _LANE)
    head_out = _silu_pallas_2d(head).reshape(-1)
    tail = x_flat[aligned:]
    tail_out = tail * jax.nn.sigmoid(tail)
    return jnp.concatenate([head_out, tail_out]).reshape(orig_shape)


if __name__ == "__main__":
    key = jax.random.PRNGKey(0)
    k1, k2, k3 = jax.random.split(key, 3)

    # 1) Small NCHW input (matches the module's typical use) -> XLA fast path.
    x_small = jax.random.normal(k1, (2, 4, 16, 16), dtype=jnp.float32)
    y_small = silu(x_small)
    jax.block_until_ready(y_small)
    ref_small = x_small * jax.nn.sigmoid(x_small)
    assert y_small.shape == x_small.shape and y_small.dtype == x_small.dtype
    assert jnp.allclose(y_small, ref_small, atol=1e-5, rtol=1e-5)

    # 2) f32 input whose element count is NOT a multiple of 128: exercises the
    #    zero-copy aligned-prefix Pallas path (with a ragged last grid block)
    #    plus the tiny XLA tail.
    x_f32 = jax.random.normal(k2, (2, 4, 130, 129), dtype=jnp.float32)
    y_f32 = silu(x_f32)
    jax.block_until_ready(y_f32)
    ref_f32 = x_f32 * jax.nn.sigmoid(x_f32)
    assert y_f32.shape == x_f32.shape and y_f32.dtype == x_f32.dtype
    assert jnp.allclose(y_f32, ref_f32, atol=1e-5, rtol=1e-5)

    # 3) bf16 input, 512-lane aligned -> zero-copy wide-layout kernel path.
    x_bf16 = jax.random.normal(k3, (8, 256, 128), dtype=jnp.bfloat16)
    y_bf16 = silu(x_bf16)
    jax.block_until_ready(y_bf16)
    xf = x_bf16.astype(jnp.float32)
    ref_bf16 = (xf * jax.nn.sigmoid(xf)).astype(jnp.bfloat16)
    assert y_bf16.shape == x_bf16.shape and y_bf16.dtype == x_bf16.dtype
    assert jnp.allclose(y_bf16.astype(jnp.float32), ref_bf16.astype(jnp.float32),
                        atol=2e-2, rtol=2e-2)

    print("KERNEL_OK")
</pallas_src>

<mosaic_0001>
module attributes {stable_mosaic.version = 11 : i64} {
  func.func @_silu_kernel(%arg0: i32, %arg1: memref<528x128xf32, #tpu.memory_space<vmem>>, %arg2: memref<528x128xf32, #tpu.memory_space<vmem>>) attributes {dimension_semantics = [#tpu.dimension_semantics<parallel>], iteration_bounds = array<i64: 2>, scalar_prefetch = 0 : i64, scratch_operands = 0 : i64, tpu.core_type = #tpu.core_type<tc>, window_params = [{transform_indices = @transform_0, window_bounds = array<i64: 528, 128>}, {transform_indices = @transform_1, window_bounds = array<i64: 528, 128>}]} {
    %c0 = arith.constant 0 : index
    %c0_0 = arith.constant 0 : index
    %0 = vector.load %arg1[%c0, %c0_0] : memref<528x128xf32, #tpu.memory_space<vmem>>, vector<528x128xf32>
    %cst = arith.constant 5.000000e-01 : f32
    %1 = vector.broadcast %cst : f32 to vector<528x128xf32>
    %2 = arith.mulf %1, %0 : vector<528x128xf32>
    %cst_1 = arith.constant 5.000000e-01 : f32
    %3 = vector.broadcast %cst_1 : f32 to vector<528x128xf32>
    %4 = arith.mulf %3, %0 : vector<528x128xf32>
    %5 = math.tanh %4 : vector<528x128xf32>
    %cst_2 = arith.constant 1.000000e+00 : f32
    %6 = vector.broadcast %cst_2 : f32 to vector<528x128xf32>
    %7 = arith.addf %6, %5 : vector<528x128xf32>
    %8 = arith.mulf %2, %7 : vector<528x128xf32>
    %c0_3 = arith.constant 0 : index
    %c0_4 = arith.constant 0 : index
    %9 = vector.load %arg2[%c0_3, %c0_4] : memref<528x128xf32, #tpu.memory_space<vmem>>, vector<528x128xf32>
    tpu.vector_store %arg2[%c0_3, %c0_4], %8 {strides = array<i32>} : memref<528x128xf32, #tpu.memory_space<vmem>>, vector<528x128xf32>,
    return
  }
  func.func @transform_0(%arg0: i32) -> (i32, i32) {
    %c0_i32 = arith.constant 0 : i32
    %c0_i32_0 = arith.constant 0 : i32
    return %arg0, %c0_i32 : i32, i32
  }
  func.func @transform_1(%arg0: i32) -> (i32, i32) {
    %c0_i32 = arith.constant 0 : i32
    %c0_i32_0 = arith.constant 0 : i32
    return %arg0, %c0_i32 : i32, i32
  }
}

</mosaic_0001>

<bundles_post_ra>
// kernel: tpu_custom_call.1
= control target key start
LH: loop header
LB: loop body
LE: loop exit
PB: predicated region body
PF: predicated region fallthrough
CT: control target
= control target key end

     0   :  { %6 = vsyncpa [#allocation3], 0  ;;  %s1512_s0 = inlined_call_operand.hbm [shape: f32[1048,128], index: 0, kind: input, shape index: {}]   ;;  %s1513_s1 = inlined_call_operand.hbm [shape: f32[1048,128], index: 1, kind: output, shape index: {}]  }
   0x1   :  { %8 = vsyncpa [#allocation3 + $0x1], 0 }
   0x2   :  { %9 = vsyncpa [#allocation4], 0 }
   0x3   :  { %11 = vsyncpa [#allocation4 + $0x1], 0  ;;  %s943_s6 = smov 0   ;;  %s945_s7 = smov 0  }
   0x4   :  { %s947_s8 = smov 0   ;;  %s949_s9 = smov 0  }
   0x5 LB: > { %s964_s10 = sadd.s32 4294967295, %s925_s9   ;;  %s640_s11 = sadd.s32 4294967294, %s925_s9   ;;  %s925_s9 = sphi %s949_s9, %s1523_s9   ;;  %s921_s8 = sphi %s947_s8, %s1522_s8   ;;  %s917_s7 = sphi %s945_s7, %s1521_s7   ;;  %s913_s6 = sphi %s943_s6, %s1520_s6  }
   0x6   : > { %s968_s12 = sadd.s32 1, %s925_s9   ;;  %s24_s13 = sadd.s32 1, %s921_s8 }
   0x7   : > { %s21_s14 = ssub.s32 %s925_s9, %s968_s12  ;;  %p31_p0 = scmp.ne.s32.totalorder %s921_s8, %s917_s7 }
   0x8   : > { %p22_p1 = scmp.eq.s32.totalorder %s21_s14, 0  ;;  %p32_p2 = scmp.eq.s32.totalorder %s925_s9, 0 }
   0x9   : > { %p37_p3 = scmp.ne.s32.totalorder %s917_s7, %s913_s6  ;;  %p38_p4 = scmp.eq.s32.totalorder %s964_s10, 0 }
   0xa   : > { %s980_s15 = scalar_select %p22_p1, %s921_s8, %s24_s13  }
   0xb   : > { %p33_p5 = por %p32_p2, %p31_p0  ;;  %p982_p6 = por %p38_p4, %p37_p3 }
   0xc   : > { %p61_p7 = scmp.eq.s32.totalorder %s964_s10, 1  ;;  %p67_p8 = scmp.eq.s32.totalorder %s640_s11, 1 }
   0xd   : > { %p1514_p11 = scmp.ge.s32.totalorder %s925_s9, 2 }
   0xe   : > { %p987_p9 = por %p61_p7, %p31_p0  ;;  %p991_p10 = por %p67_p8, %p37_p3 }
   0xf   : > { %83 = sbr.rel (%p1514_p11) target bundleno = 54 (0x36), region = 16 }
  0x10   : > { %s1517_s18 = scalar_select %p991_p10, 1, 0 }
  0x14   : > { %86 = sbr.rel (!%p33_p5) target bundleno = 54 (0x36), region = 20  ;;  %s87_s19 = sand.u32 (%p33_p5), 1, %s921_s8  }
  0x15   : > { %s92_s20 = smul.u32 (%p33_p5), 66, %s925_s9  ;;  %s1003_s25 = scalar_lea.sflag (%p33_p5), [#allocation3], %s87_s19 }
  0x16   : > { %s658_s21 = smul.u32 (%p33_p5), 528, %s87_s19 }
  0x17   : > { %s93_s22 = ssub.s32 (%p33_p5), 131, %s92_s20 }
  0x18   : > { %p94_p12 = scmp.lt.s32.totalorder (%p33_p5), %s93_s22, 66  ;;  %s91_s26 = scalar_lea.vmem (%p33_p5), [#allocation2], %s658_s21 }
  0x1a   : > { %s1525_s22 = smov (!%p94_p12, %s93_s22), 66 }
  0x1b   : > { %s1000_s23 = sshll.u32 %s1525_s22, 7 }
  0x1c   : > { %s98_s24 = ssub.s32 8448, %s1000_s23 }
  0x1d   : > { %99 = vsyncadd %s1003_s25, %s98_s24  ;;  %p644_p13 = scmp.ne.s32.totalorder %s1000_s23, 0  ;;  %s656_s27 = smul.u32 8448, %s925_s9 }
  0x1e   : > { %s104_s28 = sshll.u32 %s91_s26, 4  ;;  %s839_s11 = scalar_lea.hbm %s1512_s0, 16768  ;;  %s1013_s28 = int_to_ptr.vmem [resolvable:$true] %s104_s28 }
  0x1f   : > { %s1011_s2 = scalar_lea.hbm %s1512_s0, %s656_s27 }
  0x20   : > { %s835_s3 = scalar_lea.hbm %s1011_s2, %s1000_s23  ;;  %p840_p3 = scmp.lt.s32.totalorder %s1011_s2, %s1512_s0 }
  0x21   : > { %p836_p0 = scmp.ne.s32.totalorder %s1011_s2, %s835_s3  ;;  %p841_p4 = scmp.lt.s32.totalorder %s839_s11, %s835_s3 }
  0x23   : > { %p837_p1 = pnand %p836_p0, %p644_p13  ;;  %p842_p5 = por %p841_p4, %p840_p3 }
  0x25   : > { %p838_p2 = pneg %p837_p1 }
  0x27   : > { %p843_p7 = pnand %p842_p5, %p838_p2 }
  0x29   : > { %846 = shalt.err (!%p843_p7)
}
  0x2a   : > { %s847_s19 = scalar_lea.vmem %s1013_s28, %s1000_s23  ;;  %s927_s20 = smov [#allocation2]  }
  0x2b   : > { %p848_p8 = scmp.ne.s32.totalorder %s1013_s28, %s847_s19  ;;  %s851_s21 = sshll.u32 %s927_s20, 4  ;;  %s852_s21 = int_to_ptr.vmem [resolvable:$false] %s851_s21 }
  0x2c   : > { %s853_s22 = scalar_lea.vmem %s852_s21, 16896  ;;  %p854_p1 = scmp.lt.s32.totalorder %s1013_s28, %s852_s21 }
  0x2d   : > { %p849_p12 = pnand %p848_p8, %p644_p13  ;;  %p855_p11 = scmp.lt.s32.totalorder %s853_s22, %s847_s19 }
  0x2f   : > { %p850_p0 = pneg %p849_p12  ;;  %p856_p10 = por %p855_p11, %p854_p1 }
  0x31   : > { %p857_p3 = pnand %p856_p10, %p850_p0 }
  0x33   : > { %860 = shalt.err (!%p857_p3)
}
  0x34   : > { %s928_s24 = smov 128   ;;  %s929_s26 = smov 8  }
  0x35   : > { %110 = dma.hbm_to_vmem [thread:$0]  (%p644_p13), %s1011_s2, %s1000_s23, %s1013_s28, %s1003_s25, %s928_s24, %s928_s24, %s929_s26  }
  0x36 PF: > { %p648_p2 = scmp.ge.s32.totalorder %s925_s9, 1  ;;  %p112_p4 = scmp.lt.s32.totalorder %s925_s9, 3 }
  0x38   : > { %p113_p5 = pnand %p648_p2, %p112_p4 }
  0x39   : > { %s1042_s27 = sand.u32 (!%p113_p5), 1, %s917_s7  }
  0x3a   : > { %116 = sbr.rel (%p113_p5) target bundleno = 178 (0xb2), region = 24  ;;  %s119_s30 = scalar_lea.sflag (!%p113_p5), [#allocation3], %s1042_s27 }
  0x3b   : > { %s659_s29 = smul.u32 (!%p113_p5), 528, %s1042_s27 }
  0x3d   : > { %s1048_s3 = scalar_lea.vmem (!%p113_p5), [#allocation2], %s659_s29 }
  0x3f   : > { %904 = dma.done.wait (%p982_p6), %s119_s30, 8448  }
  0x40   : > { %906 = vsyncadd (%p982_p6), %s119_s30, 4294958848  ;;  %v151_v0 = vld [vmem:[%s1048_s3] sm:$0xff]  ;;  %v152_v1 = vld [vmem:[%s1048_s3 + $0x8] sm:$0xff]  ;;  %s1141_s16 = scalar_lea.vmem [#allocation5], %s659_s29  ;;  %s548_s23 = scalar_lea.sflag [#allocation4], %s1042_s27 }
  0x41   : > { %v153_v2 = vld [vmem:[%s1048_s3 + $0x10] sm:$0xff]  ;;  %v217_v3 = vmul.f32 0.5, %v151_v0  ;;  %v1057_v4 = vmul.f32 0.5, %v152_v1  ;;  %v154_v6 = vld [vmem:[%s1048_s3 + $0x18] sm:$0xff]  ;;  %v155_v7 = vld [vmem:[%s1048_s3 + $0x20] sm:$0xff]  ;;  %s555_s25 = smul.u32 (%p987_p9), 66, %s964_s10 }
  0x42   : > { %v1059_v5 = vmul.f32 0.5, %v153_v2  ;;  %v156_v8 = vld [vmem:[%s1048_s3 + $0x28] sm:$0xff]  ;;  %v1064_v9 = vmul.f32 0.5, %v154_v6  ;;  %v157_v10 = vld [vmem:[%s1048_s3 + $0x30] sm:$0xff]  ;;  %v1067_v11 = vmul.f32 0.5, %v155_v7  ;;  %v158_v12 = vld [vmem:[%s1048_s3 + $0x38] sm:$0xff] }
  0x43   : > { %703 = vtanh.f32 %v217_v3  ;;  %v1071_v13 = vmul.f32 0.5, %v156_v8  ;;  %v159_v14 = vld [vmem:[%s1048_s3 + $0x40] sm:$0xff]  ;;  %v1075_v15 = vmul.f32 0.5, %v157_v10  ;;  %v160_v16 = vld [vmem:[%s1048_s3 + $0x48] sm:$0xff]  ;;  %v1079_v17 = vmul.f32 0.5, %v158_v12  ;;  %v161_v18 = vld [vmem:[%s1048_s3 + $0x50] sm:$0xff] }
  0x44   : > { %705 = vtanh.f32 %v1057_v4  ;;  %v1083_v19 = vmul.f32 0.5, %v159_v14  ;;  %v162_v20 = vld [vmem:[%s1048_s3 + $0x58] sm:$0xff]  ;;  %v1087_v21 = vmul.f32 0.5, %v160_v16  ;;  %v163_v22 = vld [vmem:[%s1048_s3 + $0x60] sm:$0xff]  ;;  %v1091_v23 = vmul.f32 0.5, %v161_v18  ;;  %v164_v24 = vld [vmem:[%s1048_s3 + $0x68] sm:$0xff] }
  0x45   : > { %707 = vtanh.f32 %v1059_v5  ;;  %v1095_v25 = vmul.f32 0.5, %v162_v20  ;;  %v165_v26 = vld [vmem:[%s1048_s3 + $0x70] sm:$0xff]  ;;  %v1099_v27 = vmul.f32 0.5, %v163_v22  ;;  %v166_v28 = vld [vmem:[%s1048_s3 + $0x78] sm:$0xff]  ;;  %v1103_v29 = vmul.f32 0.5, %v164_v24  ;;  %v167_v30 = vld [vmem:[%s1048_s3 + $0x80] sm:$0xff] }
  0x46   : > { %709 = vtanh.f32 %v1064_v9  ;;  %v1107_v31 = vmul.f32 0.5, %v165_v26  ;;  %v168_v32 = vld [vmem:[%s1048_s3 + $0x88] sm:$0xff]  ;;  %v1111_v33 = vmul.f32 0.5, %v166_v28  ;;  %v169_v34 = vld [vmem:[%s1048_s3 + $0x90] sm:$0xff]  ;;  %v1115_v35 = vmul.f32 0.5, %v167_v30  ;;  %v170_v36 = vld [vmem:[%s1048_s3 + $0x98] sm:$0xff] }
  0x47   : > { %711 = vtanh.f32 %v1067_v11  ;;  %v1119_v38 = vmul.f32 0.5, %v168_v32  ;;  %v171_v39 = vld [vmem:[%s1048_s3 + $0xa0] sm:$0xff]  ;;  %v1123_v42 = vmul.f32 0.5, %v169_v34  ;;  %v172_v43 = vld [vmem:[%s1048_s3 + $0xa8] sm:$0xff]  ;;  %v1127_v46 = vmul.f32 0.5, %v170_v36  ;;  %v173_v47 = vld [vmem:[%s1048_s3 + $0xb0] sm:$0xff] }
  0x48   : > { %713 = vtanh.f32 %v1071_v13  ;;  %v1131_v51 = vmul.f32 0.5, %v171_v39  ;;  %v174_v52 = vld [vmem:[%s1048_s3 + $0xb8] sm:$0xff]  ;;  %v1136_v56 = vmul.f32 0.5, %v172_v43  ;;  %v175_v57 = vld [vmem:[%s1048_s3 + $0xc0] sm:$0xff]  ;;  %v1146_v61 = vmul.f32 0.5, %v173_v47  ;;  %v176_v62 = vld [vmem:[%s1048_s3 + $0xc8] sm:$0xff] }
  0x49   : > { %715 = vtanh.f32 %v1075_v15  ;;  %v1152_v2 = vmul.f32 0.5, %v174_v52  ;;  %v1158_v7 = vmul.f32 0.5, %v175_v57  ;;  %v178_v8 = vld [vmem:[%s1048_s3 + $0xd8] sm:$0xff]  ;;  %v1164_v14 = vmul.f32 0.5, %v176_v62  ;;  %v179_v16 = vld [vmem:[%s1048_s3 + $0xe0] sm:$0xff]  ;;  %v180_v24 = vld [vmem:[%s1048_s3 + $0xe8] sm:$0xff] }
  0x4a   : > { %717 = vtanh.f32 %v1079_v17  ;;  %v1176_v30 = vmul.f32 0.5, %v178_v8  ;;  %v181_v32 = vld [vmem:[%s1048_s3 + $0xf0] sm:$0xff]  ;;  %v182_v39 = vld [vmem:[%s1048_s3 + $0xf8] sm:$0xff]  ;;  %v1188_v43 = vmul.f32 0.5, %v180_v24  ;;  %s556_s28 = ssub.s32 (%p987_p9), 131, %s555_s25 }
  0x4b   : > { %719 = vtanh.f32 %v1083_v19  ;;  %p557_p6 = scmp.lt.s32.totalorder (%p987_p9), %s556_s28, 66 }
  0x4c   : > { %721 = vtanh.f32 %v1087_v21 }
  0x4d   : > { %723 = vtanh.f32 %v1091_v23 }
  0x4e   : > { %725 = vtanh.f32 %v1095_v25 }
  0x4f   : > { %727 = vtanh.f32 %v1099_v27 }
  0x50   : > { %v704_v37 = vpop.eup %703  ;;  %729 = vtanh.f32 %v1103_v29 }
  0x51   : > { %v706_v40 = vpop.eup %705  ;;  %v349_v41 = vadd.f32 1.0, %v704_v37  ;;  %731 = vtanh.f32 %v1107_v31  ;;  %v1182_v37 = vmul.f32 0.5, %v179_v16 }
  0x52   : > { %v708_v44 = vpop.eup %707  ;;  %v350_v45 = vadd.f32 1.0, %v706_v40  ;;  %733 = vtanh.f32 %v1111_v33 }
  0x53   : > { %v710_v48 = vpop.eup %709  ;;  %v415_v49 = vmul.f32 %v349_v41, %v217_v3  ;;  %v351_v50 = vadd.f32 1.0, %v708_v44  ;;  %735 = vtanh.f32 %v1115_v35  ;;  %v177_v3 = vld [vmem:[%s1048_s3 + $0xd0] sm:$0xff]  ;;  %v183_v44 = vld [vmem:[%s1048_s3 + $0x100] sm:$0xff] }
  0x54   : > { %v712_v53 = vpop.eup %711  ;;  %v416_v54 = vmul.f32 %v350_v45, %v1057_v4  ;;  %v352_v55 = vadd.f32 1.0, %v710_v48  ;;  %737 = vtanh.f32 %v1119_v38  ;;  %v1170_v22 = vmul.f32 0.5, %v177_v3 }
  0x55   : > { %v714_v58 = vpop.eup %713  ;;  %481 = vst [vmem:[%s1141_s16] sm:$0xff] %v415_v49  ;;  %v417_v59 = vmul.f32 %v351_v50, %v1059_v5  ;;  %v353_v60 = vadd.f32 1.0, %v712_v53  ;;  %739 = vtanh.f32 %v1123_v42  ;;  %v1194_v48 = vmul.f32 0.5, %v181_v32  ;;  %v184_v49 = vld [vmem:[%s1048_s3 + $0x108] sm:$0xff] }
  0x56   : > { %v716_v63 = vpop.eup %715  ;;  %482 = vst [vmem:[%s1141_s16 + $0x8] sm:$0xff] %v416_v54  ;;  %v418_v0 = vmul.f32 %v352_v55, %v1064_v9  ;;  %v354_v1 = vadd.f32 1.0, %v714_v58  ;;  %741 = vtanh.f32 %v1127_v46  ;;  %v1200_v53 = vmul.f32 0.5, %v182_v39  ;;  %v185_v54 = vld [vmem:[%s1048_s3 + $0x110] sm:$0xff] }
  0x57   : > { %v718_v4 = vpop.eup %717  ;;  %483 = vst [vmem:[%s1141_s16 + $0x10] sm:$0xff] %v417_v59  ;;  %v419_v5 = vmul.f32 %v353_v60, %v1067_v11  ;;  %v355_v6 = vadd.f32 1.0, %v716_v63  ;;  %743 = vtanh.f32 %v1131_v51  ;;  %v1206_v58 = vmul.f32 0.5, %v183_v44  ;;  %v186_v59 = vld [vmem:[%s1048_s3 + $0x118] sm:$0xff] }
  0x58   : > { %v720_v9 = vpop.eup %719  ;;  %484 = vst [vmem:[%s1141_s16 + $0x18] sm:$0xff] %v418_v0  ;;  %v420_v10 = vmul.f32 %v354_v1, %v1071_v13  ;;  %v356_v12 = vadd.f32 1.0, %v718_v4  ;;  %745 = vtanh.f32 %v1136_v56  ;;  %v1212_v63 = vmul.f32 0.5, %v184_v49  ;;  %v187_v0 = vld [vmem:[%s1048_s3 + $0x120] sm:$0xff] }
  0x59   : > { %v722_v11 = vpop.eup %721  ;;  %485 = vst [vmem:[%s1141_s16 + $0x20] sm:$0xff] %v419_v5  ;;  %v421_v18 = vmul.f32 %v355_v6, %v1075_v15  ;;  %v357_v20 = vadd.f32 1.0, %v720_v9  ;;  %747 = vtanh.f32 %v1146_v61  ;;  %v1218_v4 = vmul.f32 0.5, %v185_v54  ;;  %v188_v5 = vld [vmem:[%s1048_s3 + $0x128] sm:$0xff] }
  0x5a   : > { %v724_v13 = vpop.eup %723  ;;  %486 = vst [vmem:[%s1141_s16 + $0x28] sm:$0xff] %v420_v10  ;;  %v422_v26 = vmul.f32 %v356_v12, %v1079_v17  ;;  %v358_v28 = vadd.f32 1.0, %v722_v11  ;;  %749 = vtanh.f32 %v1152_v2  ;;  %v1224_v9 = vmul.f32 0.5, %v186_v59  ;;  %v189_v10 = vld [vmem:[%s1048_s3 + $0x130] sm:$0xff] }
  0x5b   : > { %v726_v15 = vpop.eup %725  ;;  %487 = vst [vmem:[%s1141_s16 + $0x30] sm:$0xff] %v421_v18  ;;  %v423_v34 = vmul.f32 %v357_v20, %v1083_v19  ;;  %v359_v36 = vadd.f32 1.0, %v724_v13  ;;  %751 = vtanh.f32 %v1158_v7  ;;  %v1230_v11 = vmul.f32 0.5, %v187_v0  ;;  %v190_v18 = vld [vmem:[%s1048_s3 + $0x138] sm:$0xff] }
  0x5c   : > { %v728_v17 = vpop.eup %727  ;;  %488 = vst [vmem:[%s1141_s16 + $0x38] sm:$0xff] %v422_v26  ;;  %v424_v40 = vmul.f32 %v358_v28, %v1087_v21  ;;  %v360_v41 = vadd.f32 1.0, %v726_v15  ;;  %753 = vtanh.f32 %v1164_v14  ;;  %v1236_v13 = vmul.f32 0.5, %v188_v5  ;;  %v191_v26 = vld [vmem:[%s1048_s3 + $0x140] sm:$0xff] }
  0x5d   : > { %v730_v19 = vpop.eup %729  ;;  %489 = vst [vmem:[%s1141_s16 + $0x40] sm:$0xff] %v423_v34  ;;  %v425_v45 = vmul.f32 %v359_v36, %v1091_v23  ;;  %v361_v47 = vadd.f32 1.0, %v728_v17  ;;  %755 = vtanh.f32 %v1170_v22  ;;  %v1242_v15 = vmul.f32 0.5, %v189_v10  ;;  %v192_v34 = vld [vmem:[%s1048_s3 + $0x148] sm:$0xff] }
  0x5e   : > { %v732_v21 = vpop.eup %731  ;;  %490 = vst [vmem:[%s1141_s16 + $0x48] sm:$0xff] %v424_v40  ;;  %v426_v50 = vmul.f32 %v360_v41, %v1095_v25  ;;  %v362_v52 = vadd.f32 1.0, %v730_v19  ;;  %757 = vtanh.f32 %v1176_v30  ;;  %v1248_v17 = vmul.f32 0.5, %v190_v18  ;;  %v193_v40 = vld [vmem:[%s1048_s3 + $0x150] sm:$0xff] }
  0x5f   : > { %v734_v23 = vpop.eup %733  ;;  %491 = vst [vmem:[%s1141_s16 + $0x50] sm:$0xff] %v425_v45  ;;  %v427_v55 = vmul.f32 %v361_v47, %v1099_v27  ;;  %v363_v57 = vadd.f32 1.0, %v732_v21  ;;  %759 = vtanh.f32 %v1182_v37  ;;  %v1254_v19 = vmul.f32 0.5, %v191_v26  ;;  %v194_v45 = vld [vmem:[%s1048_s3 + $0x158] sm:$0xff] }
  0x60   : > { %v736_v25 = vpop.eup %735  ;;  %492 = vst [vmem:[%s1141_s16 + $0x58] sm:$0xff] %v426_v50  ;;  %v428_v60 = vmul.f32 %v362_v52, %v1103_v29  ;;  %v364_v62 = vadd.f32 1.0, %v734_v23  ;;  %761 = vtanh.f32 %v1188_v43  ;;  %v1260_v21 = vmul.f32 0.5, %v192_v34  ;;  %v195_v50 = vld [vmem:[%s1048_s3 + $0x160] sm:$0xff] }
  0x61   : > { %v738_v27 = vpop.eup %737  ;;  %493 = vst [vmem:[%s1141_s16 + $0x60] sm:$0xff] %v427_v55  ;;  %v429_v1 = vmul.f32 %v363_v57, %v1107_v31  ;;  %v365_v3 = vadd.f32 1.0, %v736_v25  ;;  %763 = vtanh.f32 %v1194_v48  ;;  %v1266_v23 = vmul.f32 0.5, %v193_v40  ;;  %v196_v55 = vld [vmem:[%s1048_s3 + $0x168] sm:$0xff] }
  0x62   : > { %v740_v29 = vpop.eup %739  ;;  %494 = vst [vmem:[%s1141_s16 + $0x68] sm:$0xff] %v428_v60  ;;  %v430_v6 = vmul.f32 %v364_v62, %v1111_v33  ;;  %v366_v8 = vadd.f32 1.0, %v738_v27  ;;  %765 = vtanh.f32 %v1200_v53  ;;  %v1272_v25 = vmul.f32 0.5, %v194_v45  ;;  %v197_v60 = vld [vmem:[%s1048_s3 + $0x170] sm:$0xff] }
  0x63   : > { %v742_v31 = vpop.eup %741  ;;  %495 = vst [vmem:[%s1141_s16 + $0x70] sm:$0xff] %v429_v1  ;;  %v431_v12 = vmul.f32 %v365_v3, %v1115_v35  ;;  %v367_v16 = vadd.f32 1.0, %v740_v29  ;;  %767 = vtanh.f32 %v1206_v58  ;;  %v1278_v27 = vmul.f32 0.5, %v195_v50  ;;  %v198_v1 = vld [vmem:[%s1048_s3 + $0x178] sm:$0xff] }
  0x64   : > { %v744_v33 = vpop.eup %743  ;;  %496 = vst [vmem:[%s1141_s16 + $0x78] sm:$0xff] %v430_v6  ;;  %v432_v20 = vmul.f32 %v366_v8, %v1119_v38  ;;  %v368_v24 = vadd.f32 1.0, %v742_v31  ;;  %769 = vtanh.f32 %v1212_v63  ;;  %v1284_v29 = vmul.f32 0.5, %v196_v55  ;;  %v199_v6 = vld [vmem:[%s1048_s3 + $0x180] sm:$0xff] }
  0x65   : > { %v746_v35 = vpop.eup %745  ;;  %497 = vst [vmem:[%s1141_s16 + $0x80] sm:$0xff] %v431_v12  ;;  %v433_v28 = vmul.f32 %v367_v16, %v1123_v42  ;;  %v369_v32 = vadd.f32 1.0, %v744_v33  ;;  %771 = vtanh.f32 %v1218_v4  ;;  %v1290_v31 = vmul.f32 0.5, %v197_v60  ;;  %v200_v12 = vld [vmem:[%s1048_s3 + $0x188] sm:$0xff] }
  0x66   : > { %v748_v38 = vpop.eup %747  ;;  %498 = vst [vmem:[%s1141_s16 + $0x88] sm:$0xff] %v432_v20  ;;  %v434_v36 = vmul.f32 %v368_v24, %v1127_v46  ;;  %v370_v39 = vadd.f32 1.0, %v746_v35  ;;  %773 = vtanh.f32 %v1224_v9  ;;  %v1296_v33 = vmul.f32 0.5, %v198_v1  ;;  %v201_v20 = vld [vmem:[%s1048_s3 + $0x190] sm:$0xff] }
  0x67   : > { %v750_v42 = vpop.eup %749  ;;  %499 = vst [vmem:[%s1141_s16 + $0x90] sm:$0xff] %v433_v28  ;;  %v435_v41 = vmul.f32 %v369_v32, %v1131_v51  ;;  %v371_v44 = vadd.f32 1.0, %v748_v38  ;;  %775 = vtanh.f32 %v1230_v11  ;;  %v1302_v35 = vmul.f32 0.5, %v199_v6  ;;  %v202_v28 = vld [vmem:[%s1048_s3 + $0x198] sm:$0xff] }
  0x68   : > { %v752_v46 = vpop.eup %751  ;;  %500 = vst [vmem:[%s1141_s16 + $0x98] sm:$0xff] %v434_v36  ;;  %v436_v47 = vmul.f32 %v370_v39, %v1136_v56  ;;  %v372_v49 = vadd.f32 1.0, %v750_v42  ;;  %777 = vtanh.f32 %v1236_v13  ;;  %v1308_v38 = vmul.f32 0.5, %v200_v12  ;;  %v203_v36 = vld [vmem:[%s1048_s3 + $0x1a0] sm:$0xff] }
  0x69   : > { %v754_v51 = vpop.eup %753  ;;  %501 = vst [vmem:[%s1141_s16 + $0xa0] sm:$0xff] %v435_v41  ;;  %v437_v52 = vmul.f32 %v371_v44, %v1146_v61  ;;  %v373_v54 = vadd.f32 1.0, %v752_v46  ;;  %779 = vtanh.f32 %v1242_v15  ;;  %v1314_v42 = vmul.f32 0.5, %v201_v20  ;;  %v204_v41 = vld [vmem:[%s1048_s3 + $0x1a8] sm:$0xff] }
  0x6a   : > { %v756_v56 = vpop.eup %755  ;;  %502 = vst [vmem:[%s1141_s16 + $0xa8] sm:$0xff] %v436_v47  ;;  %v438_v57 = vmul.f32 %v372_v49, %v1152_v2  ;;  %v374_v59 = vadd.f32 1.0, %v754_v51  ;;  %781 = vtanh.f32 %v1248_v17  ;;  %v1320_v46 = vmul.f32 0.5, %v202_v28  ;;  %v205_v47 = vld [vmem:[%s1048_s3 + $0x1b0] sm:$0xff] }
  0x6b   : > { %v758_v61 = vpop.eup %757  ;;  %503 = vst [vmem:[%s1141_s16 + $0xb0] sm:$0xff] %v437_v52  ;;  %v439_v62 = vmul.f32 %v373_v54, %v1158_v7  ;;  %v375_v0 = vadd.f32 1.0, %v756_v56  ;;  %783 = vtanh.f32 %v1254_v19  ;;  %v1326_v51 = vmul.f32 0.5, %v203_v36  ;;  %v206_v52 = vld [vmem:[%s1048_s3 + $0x1b8] sm:$0xff] }
  0x6c   : > { %v760_v2 = vpop.eup %759  ;;  %504 = vst [vmem:[%s1141_s16 + $0xb8] sm:$0xff] %v438_v57  ;;  %v440_v3 = vmul.f32 %v374_v59, %v1164_v14  ;;  %v376_v5 = vadd.f32 1.0, %v758_v61  ;;  %785 = vtanh.f32 %v1260_v21  ;;  %v1332_v56 = vmul.f32 0.5, %v204_v41  ;;  %v207_v57 = vld [vmem:[%s1048_s3 + $0x1c0] sm:$0xff] }
  0x6d   : > { %v762_v7 = vpop.eup %761  ;;  %505 = vst [vmem:[%s1141_s16 + $0xc0] sm:$0xff] %v439_v62  ;;  %v441_v8 = vmul.f32 %v375_v0, %v1170_v22  ;;  %v377_v10 = vadd.f32 1.0, %v760_v2  ;;  %787 = vtanh.f32 %v1266_v23  ;;  %v1338_v61 = vmul.f32 0.5, %v205_v47  ;;  %v208_v62 = vld [vmem:[%s1048_s3 + $0x1c8] sm:$0xff] }
  0x6e   : > { %v764_v14 = vpop.eup %763  ;;  %506 = vst [vmem:[%s1141_s16 + $0xc8] sm:$0xff] %v440_v3  ;;  %v442_v16 = vmul.f32 %v376_v5, %v1176_v30  ;;  %v378_v18 = vadd.f32 1.0, %v762_v7  ;;  %789 = vtanh.f32 %v1272_v25  ;;  %v1344_v2 = vmul.f32 0.5, %v206_v52  ;;  %v209_v3 = vld [vmem:[%s1048_s3 + $0x1d0] sm:$0xff] }
  0x6f   : > { %v766_v22 = vpop.eup %765  ;;  %507 = vst [vmem:[%s1141_s16 + $0xd0] sm:$0xff] %v441_v8  ;;  %v443_v24 = vmul.f32 %v377_v10, %v1182_v37  ;;  %v379_v26 = vadd.f32 1.0, %v764_v14  ;;  %791 = vtanh.f32 %v1278_v27  ;;  %v1350_v7 = vmul.f32 0.5, %v207_v57  ;;  %v210_v8 = vld [vmem:[%s1048_s3 + $0x1d8] sm:$0xff] }
  0x70   : > { %v768_v30 = vpop.eup %767  ;;  %508 = vst [vmem:[%s1141_s16 + $0xd8] sm:$0xff] %v442_v16  ;;  %v444_v32 = vmul.f32 %v378_v18, %v1188_v43  ;;  %v380_v34 = vadd.f32 1.0, %v766_v22  ;;  %793 = vtanh.f32 %v1284_v29  ;;  %v1356_v14 = vmul.f32 0.5, %v208_v62  ;;  %v211_v16 = vld [vmem:[%s1048_s3 + $0x1e0] sm:$0xff] }
  0x71   : > { %v770_v37 = vpop.eup %769  ;;  %509 = vst [vmem:[%s1141_s16 + $0xe0] sm:$0xff] %v443_v24  ;;  %v445_v39 = vmul.f32 %v379_v26, %v1194_v48  ;;  %v381_v40 = vadd.f32 1.0, %v768_v30  ;;  %795 = vtanh.f32 %v1290_v31  ;;  %v1362_v22 = vmul.f32 0.5, %v209_v3  ;;  %v212_v24 = vld [vmem:[%s1048_s3 + $0x1e8] sm:$0xff] }
  0x72   : > { %v772_v43 = vpop.eup %771  ;;  %510 = vst [vmem:[%s1141_s16 + $0xe8] sm:$0xff] %v444_v32  ;;  %v446_v44 = vmul.f32 %v380_v34, %v1200_v53  ;;  %v382_v45 = vadd.f32 1.0, %v770_v37  ;;  %797 = vtanh.f32 %v1296_v33  ;;  %v1368_v30 = vmul.f32 0.5, %v210_v8  ;;  %v213_v32 = vld [vmem:[%s1048_s3 + $0x1f0] sm:$0xff] }
  0x73   : > { %v774_v48 = vpop.eup %773  ;;  %511 = vst [vmem:[%s1141_s16 + $0xf0] sm:$0xff] %v445_v39  ;;  %v447_v49 = vmul.f32 %v381_v40, %v1206_v58  ;;  %v383_v50 = vadd.f32 1.0, %v772_v43  ;;  %799 = vtanh.f32 %v1302_v35  ;;  %v1374_v37 = vmul.f32 0.5, %v211_v16  ;;  %v214_v39 = vld [vmem:[%s1048_s3 + $0x1f8] sm:$0xff] }
  0x74   : > { %v776_v53 = vpop.eup %775  ;;  %512 = vst [vmem:[%s1141_s16 + $0xf8] sm:$0xff] %v446_v44  ;;  %v448_v54 = vmul.f32 %v382_v45, %v1212_v63  ;;  %v384_v55 = vadd.f32 1.0, %v774_v48  ;;  %801 = vtanh.f32 %v1308_v38  ;;  %v1380_v43 = vmul.f32 0.5, %v212_v24  ;;  %v215_v44 = vld [vmem:[%s1048_s3 + $0x200] sm:$0xff] }
  0x75   : > { %v778_v58 = vpop.eup %777  ;;  %513 = vst [vmem:[%s1141_s16 + $0x100] sm:$0xff] %v447_v49  ;;  %v449_v59 = vmul.f32 %v383_v50, %v1218_v4  ;;  %v385_v60 = vadd.f32 1.0, %v776_v53  ;;  %803 = vtanh.f32 %v1314_v42  ;;  %v1386_v48 = vmul.f32 0.5, %v213_v32  ;;  %v216_v49 = vld [vmem:[%s1048_s3 + $0x208] sm:$0xff] }
  0x76   : > { %v780_v63 = vpop.eup %779  ;;  %514 = vst [vmem:[%s1141_s16 + $0x108] sm:$0xff] %v448_v54  ;;  %v450_v0 = vmul.f32 %v384_v55, %v1224_v9  ;;  %v386_v1 = vadd.f32 1.0, %v778_v58  ;;  %805 = vtanh.f32 %v1320_v46  ;;  %v1392_v53 = vmul.f32 0.5, %v214_v39 }
  0x77   : > { %v782_v4 = vpop.eup %781  ;;  %515 = vst [vmem:[%s1141_s16 + $0x110] sm:$0xff] %v449_v59  ;;  %v451_v5 = vmul.f32 %v385_v60, %v1230_v11  ;;  %v387_v6 = vadd.f32 1.0, %v780_v63  ;;  %807 = vtanh.f32 %v1326_v51  ;;  %v1397_v57 = vmul.f32 0.5, %v215_v44 }
  0x78   : > { %v784_v9 = vpop.eup %783  ;;  %516 = vst [vmem:[%s1141_s16 + $0x118] sm:$0xff] %v450_v0  ;;  %v452_v10 = vmul.f32 %v386_v1, %v1236_v13  ;;  %v388_v12 = vadd.f32 1.0, %v782_v4  ;;  %809 = vtanh.f32 %v1332_v56  ;;  %v1402_v60 = vmul.f32 0.5, %v216_v49 }
  0x79   : > { %v786_v11 = vpop.eup %785  ;;  %517 = vst [vmem:[%s1141_s16 + $0x120] sm:$0xff] %v451_v5  ;;  %v453_v18 = vmul.f32 %v387_v6, %v1242_v15  ;;  %v389_v20 = vadd.f32 1.0, %v784_v9  ;;  %811 = vtanh.f32 %v1338_v61 }
  0x7a   : > { %v788_v13 = vpop.eup %787  ;;  %518 = vst [vmem:[%s1141_s16 + $0x128] sm:$0xff] %v452_v10  ;;  %v454_v26 = vmul.f32 %v388_v12, %v1248_v17  ;;  %v390_v28 = vadd.f32 1.0, %v786_v11  ;;  %813 = vtanh.f32 %v1344_v2 }
  0x7b   : > { %v790_v15 = vpop.eup %789  ;;  %519 = vst [vmem:[%s1141_s16 + $0x130] sm:$0xff] %v453_v18  ;;  %v455_v34 = vmul.f32 %v389_v20, %v1254_v19  ;;  %v391_v36 = vadd.f32 1.0, %v788_v13  ;;  %815 = vtanh.f32 %v1350_v7 }
  0x7c   : > { %v792_v17 = vpop.eup %791  ;;  %520 = vst [vmem:[%s1141_s16 + $0x138] sm:$0xff] %v454_v26  ;;  %v456_v40 = vmul.f32 %v390_v28, %v1260_v21  ;;  %v392_v41 = vadd.f32 1.0, %v790_v15  ;;  %817 = vtanh.f32 %v1356_v14 }
  0x7d   : > { %v794_v19 = vpop.eup %793  ;;  %521 = vst [vmem:[%s1141_s16 + $0x140] sm:$0xff] %v455_v34  ;;  %v457_v45 = vmul.f32 %v391_v36, %v1266_v23  ;;  %v393_v47 = vadd.f32 1.0, %v792_v17  ;;  %819 = vtanh.f32 %v1362_v22 }
  0x7e   : > { %v796_v50 = vpop.eup %795  ;;  %522 = vst [vmem:[%s1141_s16 + $0x148] sm:$0xff] %v456_v40  ;;  %v458_v21 = vmul.f32 %v392_v41, %v1272_v25  ;;  %v394_v52 = vadd.f32 1.0, %v794_v19  ;;  %821 = vtanh.f32 %v1368_v30 }
  0x7f   : > { %v798_v54 = vpop.eup %797  ;;  %523 = vst [vmem:[%s1141_s16 + $0x150] sm:$0xff] %v457_v45  ;;  %v459_v23 = vmul.f32 %v393_v47, %v1278_v27  ;;  %v395_v55 = vadd.f32 1.0, %v796_v50  ;;  %823 = vtanh.f32 %v1374_v37 }
  0x80   : > { %v800_v58 = vpop.eup %799  ;;  %524 = vst [vmem:[%s1141_s16 + $0x158] sm:$0xff] %v458_v21  ;;  %v460_v25 = vmul.f32 %v394_v52, %v1284_v29  ;;  %v396_v59 = vadd.f32 1.0, %v798_v54  ;;  %825 = vtanh.f32 %v1380_v43 }
  0x81   : > { %v802_v62 = vpop.eup %801  ;;  %525 = vst [vmem:[%s1141_s16 + $0x160] sm:$0xff] %v459_v23  ;;  %v461_v27 = vmul.f32 %v395_v55, %v1290_v31  ;;  %v397_v63 = vadd.f32 1.0, %v800_v58  ;;  %827 = vtanh.f32 %v1386_v48 }
  0x82   : > { %v804_v0 = vpop.eup %803  ;;  %526 = vst [vmem:[%s1141_s16 + $0x168] sm:$0xff] %v460_v25  ;;  %v462_v1 = vmul.f32 %v396_v59, %v1296_v33  ;;  %v398_v3 = vadd.f32 1.0, %v802_v62  ;;  %829 = vtanh.f32 %v1392_v53 }
  0x83   : > { %v806_v29 = vpop.eup %805  ;;  %527 = vst [vmem:[%s1141_s16 + $0x170] sm:$0xff] %v461_v27  ;;  %v463_v4 = vmul.f32 %v397_v63, %v1302_v35  ;;  %v399_v5 = vadd.f32 1.0, %v804_v0  ;;  %831 = vtanh.f32 %v1397_v57 }
  0x84   : > { %v808_v31 = vpop.eup %807  ;;  %528 = vst [vmem:[%s1141_s16 + $0x178] sm:$0xff] %v462_v1  ;;  %v464_v6 = vmul.f32 %v398_v3, %v1308_v38  ;;  %v400_v8 = vadd.f32 1.0, %v806_v29  ;;  %833 = vtanh.f32 %v1402_v60 }
  0x85   : > { %v810_v33 = vpop.eup %809  ;;  %529 = vst [vmem:[%s1141_s16 + $0x180] sm:$0xff] %v463_v4  ;;  %v465_v9 = vmul.f32 %v399_v5, %v1314_v42  ;;  %v401_v10 = vadd.f32 1.0, %v808_v31 }
  0x86   : > { %v812_v12 = vpop.eup %811  ;;  %530 = vst [vmem:[%s1141_s16 + $0x188] sm:$0xff] %v464_v6  ;;  %v466_v35 = vmul.f32 %v400_v8, %v1320_v46  ;;  %v402_v16 = vadd.f32 1.0, %v810_v33 }
  0x87   : > { %v814_v11 = vpop.eup %813  ;;  %531 = vst [vmem:[%s1141_s16 + $0x190] sm:$0xff] %v465_v9  ;;  %v467_v38 = vmul.f32 %v401_v10, %v1326_v51  ;;  %v403_v18 = vadd.f32 1.0, %v812_v12 }
  0x88   : > { %v816_v20 = vpop.eup %815  ;;  %532 = vst [vmem:[%s1141_s16 + $0x198] sm:$0xff] %v466_v35  ;;  %v468_v24 = vmul.f32 %v402_v16, %v1332_v56  ;;  %v404_v13 = vadd.f32 1.0, %v814_v11 }
  0x89   : > { %v818_v42 = vpop.eup %817  ;;  %533 = vst [vmem:[%s1141_s16 + $0x1a0] sm:$0xff] %v467_v38  ;;  %v469_v26 = vmul.f32 %v403_v18, %v1338_v61  ;;  %v405_v28 = vadd.f32 1.0, %v816_v20 }
  0x8a   : > { %v820_v46 = vpop.eup %819  ;;  %534 = vst [vmem:[%s1141_s16 + $0x1a8] sm:$0xff] %v468_v24  ;;  %v470_v32 = vmul.f32 %v404_v13, %v1344_v2  ;;  %v406_v15 = vadd.f32 1.0, %v818_v42 }
  0x8b   : > { %v822_v51 = vpop.eup %821  ;;  %535 = vst [vmem:[%s1141_s16 + $0x1b0] sm:$0xff] %v469_v26  ;;  %v471_v34 = vmul.f32 %v405_v28, %v1350_v7  ;;  %v407_v36 = vadd.f32 1.0, %v820_v46 }
  0x8c   : > { %v824_v56 = vpop.eup %823  ;;  %536 = vst [vmem:[%s1141_s16 + $0x1b8] sm:$0xff] %v470_v32  ;;  %v472_v39 = vmul.f32 %v406_v15, %v1356_v14  ;;  %v408_v17 = vadd.f32 1.0, %v822_v51 }
  0x8d   : > { %v826_v61 = vpop.eup %825  ;;  %537 = vst [vmem:[%s1141_s16 + $0x1c0] sm:$0xff] %v471_v34  ;;  %v473_v40 = vmul.f32 %v407_v36, %v1362_v22  ;;  %v409_v41 = vadd.f32 1.0, %v824_v56 }
  0x8e   : > { %v828_v2 = vpop.eup %827  ;;  %538 = vst [vmem:[%s1141_s16 + $0x1c8] sm:$0xff] %v472_v39  ;;  %v474_v44 = vmul.f32 %v408_v17, %v1368_v30  ;;  %v410_v19 = vadd.f32 1.0, %v826_v61 }
  0x8f   : > { %v830_v7 = vpop.eup %829  ;;  %539 = vst [vmem:[%s1141_s16 + $0x1d0] sm:$0xff] %v473_v40  ;;  %v475_v45 = vmul.f32 %v409_v41, %v1374_v37  ;;  %v411_v14 = vadd.f32 1.0, %v828_v2 }
  0x90   : > { %v832_v47 = vpop.eup %831  ;;  %540 = vst [vmem:[%s1141_s16 + $0x1d8] sm:$0xff] %v474_v44  ;;  %v476_v22 = vmul.f32 %v410_v19, %v1380_v43  ;;  %v412_v49 = vadd.f32 1.0, %v830_v7 }
  0x91   : > { %v834_v50 = vpop.eup %833  ;;  %541 = vst [vmem:[%s1141_s16 + $0x1e0] sm:$0xff] %v475_v45  ;;  %v477_v30 = vmul.f32 %v411_v14, %v1386_v48  ;;  %v413_v21 = vadd.f32 1.0, %v832_v47 }
  0x92   : > { %542 = vst [vmem:[%s1141_s16 + $0x1e8] sm:$0xff] %v476_v22  ;;  %v478_v52 = vmul.f32 %v412_v49, %v1392_v53  ;;  %v414_v54 = vadd.f32 1.0, %v834_v50  ;;  %554 = sbr.rel (!%p987_p9) target bundleno = 178 (0xb2), region = 32 }
  0x93   : > { %543 = vst [vmem:[%s1141_s16 + $0x1f0] sm:$0xff] %v477_v30  ;;  %v479_v37 = vmul.f32 %v413_v21, %v1397_v57 }
  0x94   : > { %544 = vst [vmem:[%s1141_s16 + $0x1f8] sm:$0xff] %v478_v52  ;;  %v480_v23 = vmul.f32 %v414_v54, %v1402_v60 }
  0x95   : > { %545 = vst [vmem:[%s1141_s16 + $0x200] sm:$0xff] %v479_v37 }
  0x96   : > { %546 = vst [vmem:[%s1141_s16 + $0x208] sm:$0xff] %v480_v23 }
  0x97   : > { %s1527_s28 = smov (!%p557_p6, %s556_s28), 66 }
  0x98   : > { %s1454_s2 = sshll.u32 %s1527_s28, 7 }
  0x99   : > { %s561_s4 = ssub.s32 8448, %s1454_s2 }
  0x9a   : > { %562 = vsyncadd %s548_s23, %s561_s4  ;;  %p650_p10 = scmp.ne.s32.totalorder %s1454_s2, 0  ;;  %s657_s17 = smul.u32 8448, %s964_s10 }
  0x9b   : > { %s567_s5 = sshll.u32 %s1141_s16, 4  ;;  %s930_s20 = smov [#allocation5]   ;;  %s1467_s5 = int_to_ptr.vmem [resolvable:$true] %s567_s5 }
  0x9c   : > { %s1465_s14 = scalar_lea.hbm %s1513_s1, %s657_s17  ;;  %s861_s19 = scalar_lea.vmem %s1467_s5, %s1454_s2 }
  0x9d   : > { %p862_p9 = scmp.ne.s32.totalorder %s1467_s5, %s861_s19  ;;  %s865_s21 = sshll.u32 %s930_s20, 4  ;;  %s866_s21 = int_to_ptr.vmem [resolvable:$false] %s865_s21 }
  0x9e   : > { %s867_s10 = scalar_lea.vmem %s866_s21, 16896  ;;  %p868_p7 = scmp.lt.s32.totalorder %s1467_s5, %s866_s21 }
  0x9f   : > { %p863_p11 = pnand %p862_p9, %p650_p10  ;;  %p869_p8 = scmp.lt.s32.totalorder %s867_s10, %s861_s19 }
  0xa1   : > { %p864_p13 = pneg %p863_p11  ;;  %p870_p12 = por %p869_p8, %p868_p7 }
  0xa3   : > { %p871_p0 = pnand %p870_p12, %p864_p13 }
  0xa5   : > { %874 = shalt.err (!%p871_p0)
}
  0xa6   : > { %s875_s22 = scalar_lea.hbm %s1465_s14, %s1454_s2  ;;  %s879_s29 = scalar_lea.hbm %s1513_s1, 16768 }
  0xa7   : > { %p876_p1 = scmp.ne.s32.totalorder %s1465_s14, %s875_s22  ;;  %p880_p4 = scmp.lt.s32.totalorder %s1465_s14, %s1513_s1 }
  0xa8   : > { %p881_p5 = scmp.lt.s32.totalorder %s879_s29, %s875_s22 }
  0xa9   : > { %p877_p3 = pnand %p876_p1, %p650_p10 }
  0xaa   : > { %p882_p6 = por %p881_p5, %p880_p4 }
  0xab   : > { %p878_p2 = pneg %p877_p3 }
  0xad   : > { %p883_p9 = pnand %p882_p6, %p878_p2 }
  0xaf   : > { %886 = shalt.err (!%p883_p9)
}
  0xb0   : > { %s931_s16 = smov 128   ;;  %s932_s25 = smov 8  }
  0xb1   : > { %573 = dma.vmem_to_hbm [thread:$0]  (%p650_p10), %s1467_s5, %s1454_s2, %s1465_s14, %s548_s23, %s931_s16, %s931_s16, %s932_s25  }
  0xb2 PF: > { %s582_s28 = sand.u32 1, %s913_s6   ;;  %p1518_p11 = scmp.ne.s32.totalorder %s1517_s18, 0 }
  0xb3   : > { %p1519_p13 = scmp.ge.s32.totalorder %s925_s9, 2  ;;  %s583_s4 = scalar_lea.sflag [#allocation4], %s582_s28 }
  0xb5   : > { %p663_p7 = pnand %p1519_p13, %p1518_p11 }
  0xb7   : > { %p664_p8 = pneg %p663_p7 }
  0xb9   : > { %908 = dma.done.wait (%p664_p8), %s583_s4, 8448  }
  0xba   : > { %910 = vsyncadd (%p664_p8), %s583_s4, 4294958848  ;;  %p14_p12 = scmp.ge.s32.totalorder %s968_s12, 4   ;;  %s1520_s6 = smov %s917_s7 }
  0xbb   : > { %s1521_s7 = smov %s921_s8  ;;  %s1522_s8 = smov %s980_s15 }
  0xbc   : > { %s1523_s9 = smov %s968_s12  ;;  %16 = sbr.rel (!%p14_p12) target bundleno = 5 (0x5), region = 69 }
  0xc1   :  { %588 = vsyncpa [#allocation3], 1 }
  0xc2   :  { %590 = vsyncpa [#allocation3 + $0x1], 1 }
  0xc3   :  { %591 = vsyncpa [#allocation4], 1 }
  0xc4   :  { %593 = vsyncpa [#allocation4 + $0x1], 1 }

</bundles_post_ra>
